<compile_context>
chip_gen: v5e
topology: v5e:2x2
jax: 0.10.0
libtpu: 0.0.40
codegen_flags: <defaults>
</compile_context>

<pallas_src>
from functools import partial

import numpy as np
import jax
import jax.numpy as jnp
from jax import lax
from jax.experimental import pallas as pl
from jax.experimental.pallas import tpu as pltpu

LANE = 128


def _round_up(n, m):
    return ((n + m - 1) // m) * m


def fold_bn(gamma, beta, mean, var, eps=1e-5):
    """Eval-mode BatchNorm folded into per-channel scale/bias."""
    scale = gamma / jnp.sqrt(var + eps)
    return scale, beta - mean * scale


# ---------------------------------------------------------------------------
# Kernel 1: stride-1 3x3 (dilated) conv + folded BN (+ReLU) (+fused residual)
# ---------------------------------------------------------------------------
def _conv3x3_kernel(x_hbm, w_ref, s_ref, b_ref, *rest,
                    th, wo, wb, d, relu, has_res):
    if has_res:
        res_ref, out_ref, xbuf, sem, acc_ref = rest
    else:
        out_ref, xbuf, sem, acc_ref = rest

    n = pl.program_id(0)
    t = pl.program_id(1)
    nt = pl.num_programs(1)
    nrows = th + 2 * d
    cp = xbuf.shape[-1]
    cout_p = out_ref.shape[-1]
    slot = lax.rem(t, 2)

    def dma(ti, si, case):
        # case 0: first row tile, 1: interior tile, 2: last row tile.
        if case == 0:
            src = x_hbm.at[n, pl.ds(0, th + d), :, :]
            dst = xbuf.at[si, pl.ds(d, th + d), pl.ds(d, wo), :]
        elif case == 1:
            src = x_hbm.at[n, pl.ds(ti * th - d, nrows), :, :]
            dst = xbuf.at[si, pl.ds(0, nrows), pl.ds(d, wo), :]
        else:
            src = x_hbm.at[n, pl.ds(ti * th - d, th + d), :, :]
            dst = xbuf.at[si, pl.ds(0, th + d), pl.ds(d, wo), :]
        return pltpu.make_async_copy(src, dst, sem.at[si])

    def issue(ti, si):
        @pl.when(ti == 0)
        def _():
            xbuf[si, pl.ds(0, d), :, :] = jnp.zeros((d, wb, cp), xbuf.dtype)
            dma(ti, si, 0).start()

        @pl.when(jnp.logical_and(ti > 0, ti < nt - 1))
        def _():
            dma(ti, si, 1).start()

        @pl.when(jnp.logical_and(ti > 0, ti == nt - 1))
        def _():
            xbuf[si, pl.ds(th + d, d), :, :] = jnp.zeros((d, wb, cp), xbuf.dtype)
            dma(ti, si, 2).start()

    def wait(ti, si):
        @pl.when(ti == 0)
        def _():
            dma(ti, si, 0).wait()

        @pl.when(jnp.logical_and(ti > 0, ti < nt - 1))
        def _():
            dma(ti, si, 1).wait()

        @pl.when(jnp.logical_and(ti > 0, ti == nt - 1))
        def _():
            dma(ti, si, 2).wait()

    # Prime: zero both slots (left/right column halos then stay zero for the
    # whole image -- DMAs only ever write the interior columns) and fetch tile 0.
    @pl.when(t == 0)
    def _():
        xbuf[...] = jnp.zeros(xbuf.shape, xbuf.dtype)
        issue(t, slot)

    # Wait for this tile's rows, then prefetch the next tile into the other slot
    # so its HBM read overlaps this tile's matmuls.
    wait(t, slot)

    @pl.when(t + 1 < nt)
    def _():
        issue(t + 1, 1 - slot)

    # 9 taps; each is a (th*wo, Cp) x (Cp, Cout_p) bf16 MXU matmul, f32 accum.
    for ky in range(3):
        for kx in range(3):
            patch = xbuf[slot, pl.ds(ky * d, th), pl.ds(kx * d, wo), :]
            patch = patch.reshape(th * wo, cp)
            contrib = jnp.dot(patch, w_ref[ky * 3 + kx],
                              preferred_element_type=jnp.float32)
            if ky == 0 and kx == 0:
                acc_ref[...] = contrib
            else:
                acc_ref[...] += contrib

    y = acc_ref[...] * s_ref[...] + b_ref[...]          # folded BN affine (f32)
    if relu:
        y = jnp.maximum(y, 0.0)
    y = y.reshape(th, wo, cout_p)
    if has_res:
        y = y + res_ref[0].astype(jnp.float32)           # fused residual add
    out_ref[0] = y.astype(out_ref.dtype)


@partial(jax.jit, static_argnames=("dilation", "relu"))
def conv3x3_bn(x, wt, scale, bias, residual=None, *, dilation, relu):
    """x: (N,H,W,Cp) bf16 with Cp % 128 == 0 (zero-padded channels).
    wt: (3,3,Cin,Cout) f32 (unpadded). Stride-1 "same" conv.
    Returns (N,H,W,Cout_p) bf16."""
    N, H, W, Cp = x.shape
    kh, kw, cin, cout = wt.shape
    d = dilation
    cout_p = _round_up(cout, LANE)
    assert kh == 3 and kw == 3
    assert Cp % LANE == 0 and cin <= Cp

    th = 32 if (d >= 4 and H % 32 == 0) else (16 if H % 16 == 0 else 8)
    assert H % th == 0
    nt = H // th
    assert nt >= 2, "need at least two row tiles per image"
    wb = _round_up(W + 2 * d, 16)        # scratch width (keeps reshapes clean)
    nrows = th + 2 * d

    # Weights -> (9, Cp, Cout_p) bf16; BN scale/bias zero-padded so the padded
    # output channels stay exactly zero through the whole network.
    wp = jnp.zeros((3, 3, Cp, cout_p), jnp.bfloat16)
    wp = wp.at[:, :, :cin, :cout].set(wt.astype(jnp.bfloat16))
    wp = wp.reshape(9, Cp, cout_p)
    sp = jnp.zeros((1, cout_p), jnp.float32).at[0, :cout].set(scale)
    bp = jnp.zeros((1, cout_p), jnp.float32).at[0, :cout].set(bias)

    in_specs = [
        pl.BlockSpec(memory_space=pl.ANY),                      # x stays in HBM
        pl.BlockSpec((9, Cp, cout_p), lambda n, t: (0, 0, 0)),
        pl.BlockSpec((1, cout_p), lambda n, t: (0, 0)),
        pl.BlockSpec((1, cout_p), lambda n, t: (0, 0)),
    ]
    args = [x, wp, sp, bp]
    if residual is not None:
        assert residual.shape == (N, H, W, cout_p)
        in_specs.append(pl.BlockSpec((1, th, W, cout_p),
                                     lambda n, t: (n, t, 0, 0)))
        args.append(residual.astype(jnp.bfloat16))

    kern = partial(_conv3x3_kernel, th=th, wo=W, wb=wb, d=d, relu=relu,
                   has_res=residual is not None)
    return pl.pallas_call(
        kern,
        out_shape=jax.ShapeDtypeStruct((N, H, W, cout_p), jnp.bfloat16),
        grid=(N, nt),
        in_specs=in_specs,
        out_specs=pl.BlockSpec((1, th, W, cout_p), lambda n, t: (n, t, 0, 0)),
        scratch_shapes=[
            pltpu.VMEM((2, nrows, wb, Cp), jnp.bfloat16),   # double-buffered halo
            pltpu.SemaphoreType.DMA((2,)),
            pltpu.VMEM((th * W, cout_p), jnp.float32),      # f32 accumulator
        ],
        compiler_params=pltpu.CompilerParams(
            dimension_semantics=("parallel", "arbitrary"),
            vmem_limit_bytes=32 * 1024 * 1024),
    )(*args)


# ---------------------------------------------------------------------------
# Kernel 2: 1x1 conv (channel matmul) + folded BN (+ReLU)
# ---------------------------------------------------------------------------
def _matmul_bn_kernel(x_ref, w_ref, s_ref, b_ref, o_ref, *, relu):
    y = jnp.dot(x_ref[...], w_ref[...], preferred_element_type=jnp.float32)
    y = y * s_ref[...] + b_ref[...]
    if relu:
        y = jnp.maximum(y, 0.0)
    o_ref[...] = y.astype(o_ref.dtype)


@partial(jax.jit, static_argnames=("relu",))
def conv1x1_bn(x, wt, scale, bias, *, relu):
    """x: (..., C) bf16 (any C >= Cin); wt: (...,Cin,Cout). -> (..., Cout_p) bf16."""
    lead = x.shape[:-1]
    C = x.shape[-1]
    cin, cout = wt.shape[-2], wt.shape[-1]
    assert C >= cin
    cin_p = _round_up(C, LANE)
    cout_p = _round_up(cout, LANE)

    M = int(np.prod(lead))
    TM = 512
    Mp = _round_up(M, TM)

    x2 = x.astype(jnp.bfloat16).reshape(M, C)
    if M != Mp or C != cin_p:
        x2 = jnp.pad(x2, ((0, Mp - M), (0, cin_p - C)))
    wp = jnp.zeros((cin_p, cout_p), jnp.bfloat16)
    wp = wp.at[:cin, :cout].set(wt.reshape(cin, cout).astype(jnp.bfloat16))
    sp = jnp.zeros((1, cout_p), jnp.float32).at[0, :cout].set(scale)
    bp = jnp.zeros((1, cout_p), jnp.float32).at[0, :cout].set(bias)

    y = pl.pallas_call(
        partial(_matmul_bn_kernel, relu=relu),
        out_shape=jax.ShapeDtypeStruct((Mp, cout_p), jnp.bfloat16),
        grid=(Mp // TM,),
        in_specs=[
            pl.BlockSpec((TM, cin_p), lambda i: (i, 0)),
            pl.BlockSpec((cin_p, cout_p), lambda i: (0, 0)),
            pl.BlockSpec((1, cout_p), lambda i: (0, 0)),
            pl.BlockSpec((1, cout_p), lambda i: (0, 0)),
        ],
        out_specs=pl.BlockSpec((TM, cout_p), lambda i: (i, 0)),
        compiler_params=pltpu.CompilerParams(
            dimension_semantics=("parallel",),
            vmem_limit_bytes=32 * 1024 * 1024),
    )(x2, wp, sp, bp)
    return y[:M].reshape(lead + (cout_p,))


# ---------------------------------------------------------------------------
# Network building blocks (Pallas path)
# ---------------------------------------------------------------------------
def _convbn3x3(x, p, *, dilation, relu, residual=None):
    s, b = fold_bn(*p["bn"])
    return conv3x3_bn(x, p["w"], s, b, residual, dilation=dilation, relu=relu)


def _convbn1x1(x, p, *, relu, has_bn=True):
    cout = p["w"].shape[-1]
    if has_bn:
        s, b = fold_bn(*p["bn"])
    else:
        s = jnp.ones((cout,), jnp.float32)
        b = jnp.zeros((cout,), jnp.float32)
    return conv1x1_bn(x, p["w"], s, b, relu=relu)


def _conv3x3_s2(x, p, *, relu):
    """PyTorch conv(k=3, s=2, p=1) + BN (+ReLU) via JAX-side im2col and a single
    lane-dense Pallas matmul (no 4x-redundant stride-1 compute; the Cin=3 first
    conv gets K=27 instead of nine 97%-zero K=128 matmuls)."""
    s, b = fold_bn(*p["bn"])
    cin, cout = p["w"].shape[2], p["w"].shape[3]
    N, H, W, _ = x.shape
    Ho, Wo = H // 2, W // 2
    xv = x[..., :cin]
    xp = jnp.pad(xv, ((0, 0), (1, 1), (1, 1), (0, 0)))
    taps = [xp[:, ky:ky + 2 * Ho:2, kx:kx + 2 * Wo:2, :]
            for ky in range(3) for kx in range(3)]
    k = 9 * cin
    kp = _round_up(k, LANE)
    if kp != k:
        taps.append(jnp.zeros((N, Ho, Wo, kp - k), x.dtype))
    patches = jnp.concatenate(taps, axis=-1)             # (N,Ho,Wo,kp)
    w2 = p["w"].reshape(k, cout)                          # tap-major, matches concat
    return conv1x1_bn(patches, w2, s, b, relu=relu)


# Shared (Pallas + reference) SPP glue so both paths compute them identically.
def _avg_pool(x, k):
    N, H, W, C = x.shape
    y = x.astype(jnp.float32).reshape(N, H // k, k, W // k, k, C).mean(axis=(2, 4))
    return y.astype(jnp.bfloat16)


def _bilinear_resize(x, H, W):
    N, _, _, C = x.shape
    y = jax.image.resize(x.astype(jnp.float32), (N, H, W, C), method="bilinear")
    return y.astype(jnp.bfloat16)


def _run_layer(x, blocks, *, stride, dilation):
    for i, bp in enumerate(blocks):
        s = stride if i == 0 else 1
        if s == 2:
            out = _conv3x3_s2(x, bp["conv1"], relu=True)
        else:
            out = _convbn3x3(x, bp["conv1"], dilation=dilation, relu=True)
        if bp["down"] is not None:
            xs = x[:, ::s, ::s, :] if s > 1 else x
            res = _convbn1x1(xs, bp["down"], relu=False)
        else:
            res = x
        # conv2 + BN with the residual add fused in-kernel (no final ReLU: PSMNet).
        x = _convbn3x3(out, bp["conv2"], dilation=dilation, relu=False,
                       residual=res)
    return x


def feature_extraction_pallas(x_nchw, P):
    x = jnp.transpose(x_nchw, (0, 2, 3, 1)).astype(jnp.bfloat16)   # NCHW -> NHWC

    # firstconv: convbn(3,32,s2)+ReLU (im2col matmul), 2x convbn(32,32)+ReLU.
    y = _conv3x3_s2(x, P["first"][0], relu=True)
    y = _convbn3x3(y, P["first"][1], dilation=1, relu=True)
    y = _convbn3x3(y, P["first"][2], dilation=1, relu=True)

    y = _run_layer(y, P["layer1"], stride=1, dilation=1)
    out_raw = _run_layer(y, P["layer2"], stride=2, dilation=1)
    y = _run_layer(out_raw, P["layer3"], stride=1, dilation=2)
    out_skip = _run_layer(y, P["layer4"], stride=1, dilation=4)

    N, H4, W4, _ = out_skip.shape
    branches = []
    for k, bp in zip((64, 32, 16, 8), P["branches"]):
        b = _avg_pool(out_skip[..., :128], k)
        b = _convbn1x1(b, bp, relu=True)[..., :32]    # slice before the resize
        b = _bilinear_resize(b, H4, W4)
        branches.append(b)

    feat = jnp.concatenate(
        [out_raw[..., :64], out_skip[..., :128],
         branches[3], branches[2], branches[1], branches[0],
         jnp.zeros((N, H4, W4, 64), jnp.bfloat16)],   # lane-pad 320 -> 384
        axis=-1)

    y = _convbn3x3(feat, P["last1"], dilation=1, relu=True)
    y = _convbn1x1(y, P["last2"], relu=False, has_bn=False)[..., :32]
    return jnp.transpose(y, (0, 3, 1, 2)).astype(jnp.float32)


# ---------------------------------------------------------------------------
# Pure-JAX reference (same arithmetic: bf16 activations/operands, f32 accum)
# ---------------------------------------------------------------------------
def _ref_convbn3x3(x, p, *, stride, dilation, relu, residual=None):
    s, b = fold_bn(*p["bn"])
    d = dilation
    y = lax.conv_general_dilated(
        x.astype(jnp.bfloat16), p["w"].astype(jnp.bfloat16),
        window_strides=(stride, stride), padding=((d, d), (d, d)),
        rhs_dilation=(d, d), dimension_numbers=("NHWC", "HWIO", "NHWC"),
        preferred_element_type=jnp.float32)
    y = y * s + b
    if relu:
        y = jnp.maximum(y, 0.0)
    if residual is not None:
        y = y + residual.astype(jnp.float32)
    return y.astype(jnp.bfloat16)


def _ref_convbn1x1(x, p, *, relu, has_bn=True):
    cin, cout = p["w"].shape[-2], p["w"].shape[-1]
    if has_bn:
        s, b = fold_bn(*p["bn"])
    else:
        s = jnp.ones((cout,), jnp.float32)
        b = jnp.zeros((cout,), jnp.float32)
    y = jnp.dot(x.astype(jnp.bfloat16).reshape(-1, cin),
                p["w"].reshape(cin, cout).astype(jnp.bfloat16),
                preferred_element_type=jnp.float32)
    y = y * s + b
    if relu:
        y = jnp.maximum(y, 0.0)
    return y.astype(jnp.bfloat16).reshape(x.shape[:-1] + (cout,))


def _ref_run_layer(x, blocks, *, stride, dilation):
    for i, bp in enumerate(blocks):
        s = stride if i == 0 else 1
        out = _ref_convbn3x3(x, bp["conv1"], stride=s, dilation=dilation, relu=True)
        if bp["down"] is not None:
            res = _ref_convbn1x1(x[:, ::s, ::s, :], bp["down"], relu=False)
        else:
            res = x
        x = _ref_convbn3x3(out, bp["conv2"], stride=1, dilation=dilation,
                           relu=False, residual=res)
    return x


def feature_extraction_ref(x_nchw, P):
    x = jnp.transpose(x_nchw, (0, 2, 3, 1)).astype(jnp.bfloat16)
    y = _ref_convbn3x3(x, P["first"][0], stride=2, dilation=1, relu=True)
    y = _ref_convbn3x3(y, P["first"][1], stride=1, dilation=1, relu=True)
    y = _ref_convbn3x3(y, P["first"][2], stride=1, dilation=1, relu=True)
    y = _ref_run_layer(y, P["layer1"], stride=1, dilation=1)
    out_raw = _ref_run_layer(y, P["layer2"], stride=2, dilation=1)
    y = _ref_run_layer(out_raw, P["layer3"], stride=1, dilation=2)
    out_skip = _ref_run_layer(y, P["layer4"], stride=1, dilation=4)
    N, H4, W4, _ = out_skip.shape
    branches = []
    for k, bp in zip((64, 32, 16, 8), P["branches"]):
        b = _avg_pool(out_skip, k)
        b = _ref_convbn1x1(b, bp, relu=True)
        b = _bilinear_resize(b, H4, W4)
        branches.append(b)
    feat = jnp.concatenate([out_raw, out_skip, branches[3], branches[2],
                            branches[1], branches[0]], axis=-1)
    y = _ref_convbn3x3(feat, P["last1"], stride=1, dilation=1, relu=True)
    y = _ref_convbn1x1(y, P["last2"], relu=False, has_bn=False)
    return jnp.transpose(y, (0, 3, 1, 2)).astype(jnp.float32)


# ---------------------------------------------------------------------------
# Deterministic synthetic parameters (eval-mode BN running stats), HWIO weights
# ---------------------------------------------------------------------------
def _make_convbn(key, cin, cout, ksize):
    ks = jax.random.split(key, 5)
    fan = cin * ksize * ksize
    w = jax.random.normal(ks[0], (ksize, ksize, cin, cout), jnp.float32)
    w = w * (1.0 / fan) ** 0.5
    gamma = 1.0 + 0.1 * jax.random.normal(ks[1], (cout,), jnp.float32)
    beta = 0.1 * jax.random.normal(ks[2], (cout,), jnp.float32)
    mean = 0.1 * jax.random.normal(ks[3], (cout,), jnp.float32)
    var = 1.0 + 0.1 * jax.random.uniform(ks[4], (cout,), jnp.float32)
    return {"w": w, "bn": (gamma, beta, mean, var)}


def build_params(key):
    keys = iter(jax.random.split(key, 80))
    P = {}
    P["first"] = [_make_convbn(next(keys), 3, 32, 3),
                  _make_convbn(next(keys), 32, 32, 3),
                  _make_convbn(next(keys), 32, 32, 3)]

    def make_layer(cin, cout, blocks, stride):
        layer = []
        inp = cin
        for i in range(blocks):
            s = stride if i == 0 else 1
            blk = {"conv1": _make_convbn(next(keys), inp, cout, 3),
                   "conv2": _make_convbn(next(keys), cout, cout, 3),
                   "down": None}
            if s != 1 or inp != cout:
                blk["down"] = _make_convbn(next(keys), inp, cout, 1)
            layer.append(blk)
            inp = cout
        return layer

    P["layer1"] = make_layer(32, 32, 3, 1)
    P["layer2"] = make_layer(32, 64, 16, 2)
    P["layer3"] = make_layer(64, 128, 3, 1)
    P["layer4"] = make_layer(128, 128, 3, 1)
    P["branches"] = [_make_convbn(next(keys), 128, 32, 1) for _ in range(4)]
    P["last1"] = _make_convbn(next(keys), 320, 128, 3)
    kw = next(keys)
    P["last2"] = {"w": jax.random.normal(kw, (1, 1, 128, 32), jnp.float32)
                  * (1.0 / 128) ** 0.5}
    return P


# ---------------------------------------------------------------------------
if __name__ == "__main__":
    root = jax.random.PRNGKey(0)
    pkey, xkey = jax.random.split(root)
    P = build_params(pkey)

    # Smallest input consistent with the module: SPP branch1 pools with a
    # 64x64 window on the 1/4-resolution map, so H = W = 256 (batch 1, RGB).
    N, C, H, W = 1, 3, 256, 256
    x = jax.random.normal(xkey, (N, C, H, W), jnp.float32)

    out = jax.block_until_ready(feature_extraction_pallas(x, P))
    assert out.shape == (N, 32, H // 4, W // 4), out.shape

    ref = jax.block_until_ready(feature_extraction_ref(x, P))
    err = float(jnp.max(jnp.abs(out - ref)) / (jnp.max(jnp.abs(ref)) + 1e-8))
    assert err < 3e-2, f"mismatch vs reference: rel-to-max err = {err}"

    print("KERNEL_OK")
</pallas_src>

<mosaic_0001>
module attributes {stable_mosaic.version = 11 : i64} {
  func.func @_matmul_bn_kernel(%arg0: i32, %arg1: memref<512x128xbf16, #tpu.memory_space<vmem>>, %arg2: memref<128x128xbf16, #tpu.memory_space<vmem>>, %arg3: memref<1x128xf32, #tpu.memory_space<vmem>>, %arg4: memref<1x128xf32, #tpu.memory_space<vmem>>, %arg5: memref<512x128xbf16, #tpu.memory_space<vmem>>) attributes {dimension_semantics = [#tpu.dimension_semantics<parallel>], iteration_bounds = array<i64: 32>, scalar_prefetch = 0 : i64, scratch_operands = 0 : i64, tpu.core_type = #tpu.core_type<tc>, window_params = [{transform_indices = @transform_0, window_bounds = array<i64: 512, 128>}, {pipeline_mode = #tpu.pipeline_mode<synchronous>, transform_indices = @transform_1, window_bounds = array<i64: 128, 128>}, {pipeline_mode = #tpu.pipeline_mode<synchronous>, transform_indices = @transform_2, window_bounds = array<i64: 1, 128>}, {pipeline_mode = #tpu.pipeline_mode<synchronous>, transform_indices = @transform_3, window_bounds = array<i64: 1, 128>}, {transform_indices = @transform_4, window_bounds = array<i64: 512, 128>}]} {
    %c0 = arith.constant 0 : index
    %c0_0 = arith.constant 0 : index
    %0 = vector.load %arg1[%c0, %c0_0] : memref<512x128xbf16, #tpu.memory_space<vmem>>, vector<512x128xbf16>
    %c0_1 = arith.constant 0 : index
    %c0_2 = arith.constant 0 : index
    %1 = vector.load %arg2[%c0_1, %c0_2] : memref<128x128xbf16, #tpu.memory_space<vmem>>, vector<128x128xbf16>
    %cst = arith.constant dense<0.000000e+00> : vector<512x128xf32>
    %2 = tpu.matmul %0, %1, %cst {dimension_numbers = #tpu.dot_dimension_numbers<[1], [0], [0], [1], [0, 0, 1, 1], [], []>} : vector<512x128xbf16>, vector<128x128xbf16>, vector<512x128xf32> -> vector<512x128xf32>
    %c0_3 = arith.constant 0 : index
    %c0_4 = arith.constant 0 : index
    %3 = vector.load %arg3[%c0_3, %c0_4] : memref<1x128xf32, #tpu.memory_space<vmem>>, vector<1x128xf32>
    %4 = vector.broadcast %3 : vector<1x128xf32> to vector<512x128xf32>
    %5 = arith.mulf %2, %4 : vector<512x128xf32>
    %c0_5 = arith.constant 0 : index
    %c0_6 = arith.constant 0 : index
    %6 = vector.load %arg4[%c0_5, %c0_6] : memref<1x128xf32, #tpu.memory_space<vmem>>, vector<1x128xf32>
    %7 = vector.broadcast %6 : vector<1x128xf32> to vector<512x128xf32>
    %8 = arith.addf %5, %7 : vector<512x128xf32>
    %cst_7 = arith.constant 0.000000e+00 : f32
    %9 = vector.broadcast %cst_7 : f32 to vector<512x128xf32>
    %10 = arith.maximumf %8, %9 : vector<512x128xf32>
    %11 = arith.truncf %10 : vector<512x128xf32> to vector<512x128xbf16>
    %c0_8 = arith.constant 0 : index
    %c0_9 = arith.constant 0 : index
    %12 = vector.load %arg5[%c0_8, %c0_9] : memref<512x128xbf16, #tpu.memory_space<vmem>>, vector<512x128xbf16>
    tpu.vector_store %arg5[%c0_8, %c0_9], %11 {strides = array<i32>} : memref<512x128xbf16, #tpu.memory_space<vmem>>, vector<512x128xbf16>,
    return
  }
  func.func @transform_0(%arg0: i32) -> (i32, i32) {
    %c0_i32 = arith.constant 0 : i32
    %c0_i32_0 = arith.constant 0 : i32
    return %arg0, %c0_i32 : i32, i32
  }
  func.func @transform_1(%arg0: i32) -> (i32, i32) {
    %c0_i32 = arith.constant 0 : i32
    %c0_i32_0 = arith.constant 0 : i32
    %c0_i32_1 = arith.constant 0 : i32
    return %c0_i32, %c0_i32_0 : i32, i32
  }
  func.func @transform_2(%arg0: i32) -> (i32, i32) {
    %c0_i32 = arith.constant 0 : i32
    %c0_i32_0 = arith.constant 0 : i32
    %c0_i32_1 = arith.constant 0 : i32
    return %c0_i32, %c0_i32_0 : i32, i32
  }
  func.func @transform_3(%arg0: i32) -> (i32, i32) {
    %c0_i32 = arith.constant 0 : i32
    %c0_i32_0 = arith.constant 0 : i32
    %c0_i32_1 = arith.constant 0 : i32
    return %c0_i32, %c0_i32_0 : i32, i32
  }
  func.func @transform_4(%arg0: i32) -> (i32, i32) {
    %c0_i32 = arith.constant 0 : i32
    %c0_i32_0 = arith.constant 0 : i32
    return %arg0, %c0_i32 : i32, i32
  }
}

</mosaic_0001>

<bundles_post_ra>
// kernel: conv1x1_bn.1
= control target key start
LH: loop header
LB: loop body
LE: loop exit
PB: predicated region body
PF: predicated region fallthrough
CT: control target
= control target key end

     0   :  { %9 = vsyncpa [#allocation3], 0  ;;  %s2096_s0 = inlined_call_operand.hbm [shape: bf16[16384,128], index: 0, kind: input, shape index: {}]   ;;  %s2097_s1 = inlined_call_operand.vmem [shape: bf16[128,128], index: 1, kind: input, shape index: {}]   ;;  %s2098_s2 = inlined_call_operand.vmem [shape: f32[1,128], index: 2, kind: input, shape index: {}]   ;;  %s2099_s3 = inlined_call_operand.vmem [shape: f32[1,128], index: 3, kind: input, shape index: {}]   ;;  %s2100_s4 = inlined_call_operand.hbm [shape: bf16[16384,128], index: 4, kind: output, shape index: {}]  }
   0x1   :  { %11 = vsyncpa [#allocation3 + $0x1], 0 }
   0x2   :  { %12 = vsyncpa [#allocation4], 0 }
   0x3   :  { %14 = vsyncpa [#allocation4 + $0x1], 0  ;;  %s1736_s15 = smov 0   ;;  %s1738_s16 = smov 0  }
   0x4   :  { %s1740_s17 = smov 0   ;;  %s1742_s18 = smov 0  }
   0x5 LB: > { %s1757_s19 = sadd.s32 4294967295, %s1705_s18   ;;  %s1126_s20 = sadd.s32 4294967294, %s1705_s18   ;;  %s1705_s18 = sphi %s1742_s18, %s2109_s18   ;;  %s1701_s17 = sphi %s1740_s17, %s2108_s17   ;;  %s1697_s16 = sphi %s1738_s16, %s2107_s16   ;;  %s1693_s15 = sphi %s1736_s15, %s2106_s15  }
   0x6   : > { %s1761_s21 = sadd.s32 1, %s1705_s18   ;;  %s27_s22 = sadd.s32 1, %s1701_s17 }
   0x7   : > { %s24_s23 = ssub.s32 %s1705_s18, %s1761_s21  ;;  %p34_p0 = scmp.ne.s32.totalorder %s1701_s17, %s1697_s16 }
   0x8   : > { %p25_p1 = scmp.eq.s32.totalorder %s24_s23, 0  ;;  %p35_p2 = scmp.eq.s32.totalorder %s1705_s18, 0 }
   0x9   : > { %p40_p3 = scmp.ne.s32.totalorder %s1697_s16, %s1693_s15  ;;  %p41_p4 = scmp.eq.s32.totalorder %s1757_s19, 0 }
   0xa   : > { %s1773_s24 = scalar_select %p25_p1, %s1701_s17, %s27_s22  }
   0xb   : > { %p1775_p5 = por %p35_p2, %p34_p0  ;;  %p1779_p6 = por %p41_p4, %p40_p3 }
   0xc   : > { %p127_p7 = scmp.eq.s32.totalorder %s1757_s19, 31  ;;  %p133_p8 = scmp.eq.s32.totalorder %s1126_s20, 31 }
   0xd   : > { %p1569_p9 = scmp.lt.s32.totalorder %s1705_s18, 32  ;;  %s162_s29 = sand.u32 1, %s1701_s17  }
   0xe   : > { %p1785_p10 = por %p127_p7, %p34_p0  ;;  %p1789_p11 = por %p133_p8, %p40_p3 }
   0xf   : > { %s1300_s30 = sshll.u32 %s1705_s18, 8  ;;  %s1129_s5 = sshll.u32 %s162_s29, 8 }
  0x10   : > { %s171_s8 = scalar_lea.hbm %s2096_s0, %s1300_s30  ;;  %s166_s10 = scalar_lea.vmem [#allocation2], %s1129_s5 }
  0x11   : > { %s172_s9 = sshll.u32 %s171_s8, 4  ;;  %s174_s11 = sshll.u32 %s166_s10, 4  ;;  %s173_s9 = int_to_ptr.hbm [resolvable:$true] %s172_s9  ;;  %s175_s11 = int_to_ptr.vmem [resolvable:$true] %s174_s11 }
  0x12   : > { %p1800_p12 = pnand %p1569_p9, %p1775_p5  ;;  %p1132_p13 = scmp.ge.s32.totalorder %s1705_s18, 1 }
  0x13   : > { %p182_p0 = scmp.lt.s32.totalorder %s1705_s18, 33  ;;  %s163_s13 = scalar_lea.sflag [#allocation3], %s162_s29 }
  0x14   : > { %s1609_s14 = sshra.s32 %s173_s9, 4  ;;  %p1613_p2 = pneg %p1800_p12  ;;  %s1610_s14 = int_to_ptr.hbm [resolvable:$true] %s1609_s14 }
  0x15   : > { %s1611_s20 = scalar_lea.hbm %s1610_s14, 256  ;;  %s1616_s25 = scalar_lea.hbm %s2096_s0, 8192 }
  0x16   : > { %p1612_p1 = scmp.ne.s32.totalorder %s1610_s14, %s1611_s20  ;;  %p1617_p5 = scmp.lt.s32.totalorder %s1610_s14, %s2096_s0 }
  0x17   : > { %p1618_p7 = scmp.lt.s32.totalorder %s1616_s25, %s1611_s20 }
  0x18   : > { %p1614_p3 = pnand %p1613_p2, %p1612_p1 }
  0x19   : > { %p1619_p8 = por %p1618_p7, %p1617_p5 }
  0x1a   : > { %p1615_p4 = pneg %p1614_p3 }
  0x1c   : > { %p1620_p9 = pnand %p1619_p8, %p1615_p4 }
  0x1e   : > { %1623 = shalt.err (!%p1620_p9)
}
  0x1f   : > { %s1707_s29 = smov 64   ;;  %s1708_s6 = smov 4  }
  0x20   : > { %1564 = dma.hbm_to_vmem [thread:$0]  (!%p1800_p12), %s173_s9, 4096, %s175_s11, %s163_s13, %s1707_s29, %s1707_s29, %s1708_s6  }
  0x21   : > { %p183_p1 = pnand %p1132_p13, %p182_p0 }
  0x22   : > { %s1821_s7 = sand.u32 (!%p183_p1), 1, %s1697_s16  }
  0x23   : > { %186 = sbr.rel (%p183_p1) target bundleno = 339 (0x153), region = 36  ;;  %s1133_s8 = sshll.u32 (!%p183_p1), %s1821_s7, 8 }
  0x24   : > { %s189_s10 = scalar_lea.sflag (!%p183_p1), [#allocation3], %s1821_s7  ;;  %s1827_s14 = scalar_lea.vmem (!%p183_p1), [#allocation2], %s1133_s8 }
  0x28   : > { %1684 = dma.done.wait (%p1779_p6), %s189_s10, 4096  }
  0x29   : > { %1686 = vsyncadd (%p1779_p6), %s189_s10, 4294963200  ;;  %v1340_v0 = vld [vmem:[%s2097_s1 + $0x38] sm:$0xff]  ;;  %v1339_v1 = vld [vmem:[%s2097_s1 + $0x30] sm:$0xff]  ;;  %s1038_s5 = scalar_lea.sflag [#allocation4], %s1821_s7  ;;  %s1659_s11 = scalar_lea.hbm %s2100_s4, 8192 }
  0x2a   : > { %540 = vmatpush.bf16.msra.mxu0 %v1340_v0  ;;  %1533 = vmatpush.bf16.msra.mxu1 %v1340_v0  ;;  %v1338_v2 = vld [vmem:[%s2097_s1 + $0x28] sm:$0xff]  ;;  %v1337_v3 = vld [vmem:[%s2097_s1 + $0x20] sm:$0xff]  ;;  %v1336_v4 = vld [vmem:[%s2097_s1 + $0x18] sm:$0xff] }
  0x2b   : > { %1534 = vmatpush.bf16.msra.mxu2 %v1340_v0  ;;  %1535 = vmatpush.bf16.msra.mxu3 %v1340_v0  ;;  %v1335_v5 = vld [vmem:[%s2097_s1 + $0x10] sm:$0xff]  ;;  %v1334_v6 = vld [vmem:[%s2097_s1 + $0x8] sm:$0xff]  ;;  %v1333_v7 = vld [vmem:[%s2097_s1] sm:$0xff] }
  0x2c   : > { %v1301_v8 = vld [vmem:[%s1827_s14] sm:$0xff]  ;;  %v1302_v12 = vld [vmem:[%s1827_s14 + $0x8] sm:$0xff]  ;;  %v1303_v16 = vld [vmem:[%s1827_s14 + $0x10] sm:$0xff] }
  0x2d   : > { %v1309_v9 = vld [vmem:[%s1827_s14 + $0x40] sm:$0xff]  ;;  %v1310_v13 = vld [vmem:[%s1827_s14 + $0x48] sm:$0xff]  ;;  %v1311_v17 = vld [vmem:[%s1827_s14 + $0x50] sm:$0xff] }
  0x2e   : > { %541 = vmatpush.bf16.msra.mxu0 %v1339_v1  ;;  %1536 = vmatpush.bf16.msra.mxu1 %v1339_v1  ;;  %v1317_v10 = vld [vmem:[%s1827_s14 + $0x80] sm:$0xff]  ;;  %v1318_v14 = vld [vmem:[%s1827_s14 + $0x88] sm:$0xff]  ;;  %v1319_v18 = vld [vmem:[%s1827_s14 + $0x90] sm:$0xff] }
  0x2f   : > { %1537 = vmatpush.bf16.msra.mxu2 %v1339_v1  ;;  %1538 = vmatpush.bf16.msra.mxu3 %v1339_v1  ;;  %v1325_v11 = vld [vmem:[%s1827_s14 + $0xc0] sm:$0xff]  ;;  %v1326_v15 = vld [vmem:[%s1827_s14 + $0xc8] sm:$0xff]  ;;  %v1327_v19 = vld [vmem:[%s1827_s14 + $0xd0] sm:$0xff] }
  0x30   : > { %v1304_v20 = vld [vmem:[%s1827_s14 + $0x18] sm:$0xff]  ;;  %v1305_v24 = vld [vmem:[%s1827_s14 + $0x20] sm:$0xff]  ;;  %v1306_v28 = vld [vmem:[%s1827_s14 + $0x28] sm:$0xff] }
  0x31   : > { %v1312_v21 = vld [vmem:[%s1827_s14 + $0x58] sm:$0xff]  ;;  %v1313_v25 = vld [vmem:[%s1827_s14 + $0x60] sm:$0xff]  ;;  %v1314_v29 = vld [vmem:[%s1827_s14 + $0x68] sm:$0xff] }
  0x32   : > { %542 = vmatpush.bf16.msra.mxu0 %v1338_v2  ;;  %1539 = vmatpush.bf16.msra.mxu1 %v1338_v2  ;;  %v1320_v22 = vld [vmem:[%s1827_s14 + $0x98] sm:$0xff]  ;;  %v1321_v26 = vld [vmem:[%s1827_s14 + $0xa0] sm:$0xff]  ;;  %v1322_v30 = vld [vmem:[%s1827_s14 + $0xa8] sm:$0xff] }
  0x33   : > { %1540 = vmatpush.bf16.msra.mxu2 %v1338_v2  ;;  %1541 = vmatpush.bf16.msra.mxu3 %v1338_v2  ;;  %v1328_v23 = vld [vmem:[%s1827_s14 + $0xd8] sm:$0xff]  ;;  %v1329_v27 = vld [vmem:[%s1827_s14 + $0xe0] sm:$0xff]  ;;  %v1330_v31 = vld [vmem:[%s1827_s14 + $0xe8] sm:$0xff] }
  0x34   : > { %v1307_v32 = vld [vmem:[%s1827_s14 + $0x30] sm:$0xff]  ;;  %v1308_v36 = vld [vmem:[%s1827_s14 + $0x38] sm:$0xff]  ;;  %v1892_v42 = vld [vmem:[%s2098_s2] ss:$0 sm:$0xff] }
  0x35   : > { %v1315_v33 = vld [vmem:[%s1827_s14 + $0x70] sm:$0xff]  ;;  %v1316_v37 = vld [vmem:[%s1827_s14 + $0x78] sm:$0xff]  ;;  %v1898_v44 = vld [vmem:[%s2099_s3] ss:$0 sm:$0xff] }
  0x36   : > { %543 = vmatpush.bf16.msra.mxu0 %v1337_v3  ;;  %1542 = vmatpush.bf16.msra.mxu1 %v1337_v3  ;;  %v1323_v34 = vld [vmem:[%s1827_s14 + $0xb0] sm:$0xff]  ;;  %v1324_v38 = vld [vmem:[%s1827_s14 + $0xb8] sm:$0xff] }
  0x37   : > { %1543 = vmatpush.bf16.msra.mxu2 %v1337_v3  ;;  %1544 = vmatpush.bf16.msra.mxu3 %v1337_v3  ;;  %v1331_v35 = vld [vmem:[%s1827_s14 + $0xf0] sm:$0xff]  ;;  %v1332_v39 = vld [vmem:[%s1827_s14 + $0xf8] sm:$0xff]  ;;  %s1915_s14 = scalar_lea.vmem [#allocation5], %s1133_s8  ;;  %s1341_s8 = sshll.u32 %s1757_s19, 8 }
  0x38   : > { %s1049_s25 = scalar_lea.hbm %s2100_s4, %s1341_s8  ;;  %s1050_s19 = sshll.u32 %s1915_s14, 4  ;;  %s1051_s19 = int_to_ptr.vmem [resolvable:$true] %s1050_s19 }
  0x39   : > { %s1052_s30 = sshll.u32 %s1049_s25, 4  ;;  %s1053_s30 = int_to_ptr.hbm [resolvable:$true] %s1052_s30 }
  0x3a   : > { %544 = vmatpush.bf16.msra.mxu0 %v1336_v4  ;;  %1545 = vmatpush.bf16.msra.mxu1 %v1336_v4  ;;  %s1653_s29 = sshra.s32 %s1053_s30, 4  ;;  %s1654_s29 = int_to_ptr.hbm [resolvable:$true] %s1653_s29 }
  0x3b   : > { %1546 = vmatpush.bf16.msra.mxu2 %v1336_v4  ;;  %1547 = vmatpush.bf16.msra.mxu3 %v1336_v4  ;;  %s1655_s6 = scalar_lea.hbm %s1654_s29, 256  ;;  %p1660_p0 = scmp.lt.s32.totalorder %s1654_s29, %s2100_s4 }
  0x3c   : > { %p1656_p6 = scmp.ne.s32.totalorder %s1654_s29, %s1655_s6  ;;  %p1661_p2 = scmp.lt.s32.totalorder %s1659_s11, %s1655_s6 }
  0x3e   : > { %545 = vmatpush.bf16.msra.mxu0 %v1335_v5  ;;  %1548 = vmatpush.bf16.msra.mxu1 %v1335_v5  ;;  %p1657_p12 = pnand %p1656_p6, %p1785_p10  ;;  %p1662_p3 = por %p1661_p2, %p1660_p0 }
  0x3f   : > { %1549 = vmatpush.bf16.msra.mxu2 %v1335_v5  ;;  %1550 = vmatpush.bf16.msra.mxu3 %v1335_v5 }
  0x40   : > { %p1658_p13 = pneg %p1657_p12 }
  0x42   : > { %546 = vmatpush.bf16.msra.mxu0 %v1334_v6  ;;  %1551 = vmatpush.bf16.msra.mxu1 %v1334_v6  ;;  %p1663_p4 = pnand %p1662_p3, %p1658_p13 }
  0x43   : > { %1552 = vmatpush.bf16.msra.mxu2 %v1334_v6  ;;  %1553 = vmatpush.bf16.msra.mxu3 %v1334_v6 }
  0x46   : > { %547 = vmatpush.bf16.msra.mxu0 %v1333_v7  ;;  %1554 = vmatpush.bf16.msra.mxu1 %v1333_v7 }
  0x47   : > { %1555 = vmatpush.bf16.msra.mxu2 %v1333_v7  ;;  %1556 = vmatpush.bf16.msra.mxu3 %v1333_v7 }
  0x49   : > { %548 = vmatmul.bf16.vlgmr.msra.gmra.mxu0 %v1301_v8  ;;  %588 = vmatmul.bf16.vlgmr.msra.gmra.mxu1 %v1309_v9 }
  0x4a   : > { %628 = vmatmul.bf16.vlgmr.msra.gmra.mxu2 %v1317_v10  ;;  %668 = vmatmul.bf16.vlgmr.msra.gmra.mxu3 %v1325_v11 }
  0x59   : > { %553 = vmatmul.bf16.gmra.mxu0 %v1302_v12  ;;  %593 = vmatmul.bf16.gmra.mxu1 %v1310_v13 }
  0x5a   : > { %633 = vmatmul.bf16.gmra.mxu2 %v1318_v14  ;;  %673 = vmatmul.bf16.gmra.mxu3 %v1326_v15 }
  0x69   : > { %558 = vmatmul.bf16.gmra.mxu0 %v1303_v16  ;;  %598 = vmatmul.bf16.gmra.mxu1 %v1311_v17 }
  0x6a   : > { %638 = vmatmul.bf16.gmra.mxu2 %v1319_v18  ;;  %678 = vmatmul.bf16.gmra.mxu3 %v1327_v19 }
  0x79   : > { %563 = vmatmul.bf16.gmra.mxu0 %v1304_v20  ;;  %603 = vmatmul.bf16.gmra.mxu1 %v1312_v21 }
  0x7a   : > { %643 = vmatmul.bf16.gmra.mxu2 %v1320_v22  ;;  %683 = vmatmul.bf16.gmra.mxu3 %v1328_v23 }
  0x89   : > { %568 = vmatmul.bf16.gmra.mxu0 %v1305_v24  ;;  %608 = vmatmul.bf16.gmra.mxu1 %v1313_v25 }
  0x8a   : > { %648 = vmatmul.bf16.gmra.mxu2 %v1321_v26  ;;  %688 = vmatmul.bf16.gmra.mxu3 %v1329_v27 }
  0x99   : > { %573 = vmatmul.bf16.gmra.mxu0 %v1306_v28  ;;  %613 = vmatmul.bf16.gmra.mxu1 %v1314_v29 }
  0x9a   : > { %653 = vmatmul.bf16.gmra.mxu2 %v1322_v30  ;;  %693 = vmatmul.bf16.gmra.mxu3 %v1330_v31 }
  0xa9   : > { %578 = vmatmul.bf16.gmra.mxu0 %v1307_v32  ;;  %618 = vmatmul.bf16.gmra.mxu1 %v1315_v33 }
  0xaa   : > { %658 = vmatmul.bf16.gmra.mxu2 %v1323_v34  ;;  %698 = vmatmul.bf16.gmra.mxu3 %v1331_v35 }
  0xb9   : > { %583 = vmatmul.bf16.gmra.mxu0 %v1308_v36  ;;  %623 = vmatmul.bf16.gmra.mxu1 %v1316_v37 }
  0xba   : > { %663 = vmatmul.bf16.gmra.mxu2 %v1324_v38  ;;  %703 = vmatmul.bf16.gmra.mxu3 %v1332_v39 }
  0xc6   : > { %v549_v40 = vpop.f32.mrf.mxu0  ;;  %v589_v41 = vpop.f32.mrf.mxu1 }
  0xc7   : > { %v713_v43 = vmul.f32 %v1892_v42, %v549_v40  ;;  %v729_v45 = vmul.f32 %v1892_v42, %v589_v41 }
  0xc9   : > { %v781_v50 = vadd.f32 %v1898_v44, %v713_v43  ;;  %v797_v51 = vadd.f32 %v1898_v44, %v729_v45 }
  0xcb   : > { %v845_v58 = vmax.f32 %v781_v50, 0.0  ;;  %v861_v59 = vmax.f32 %v797_v51, 0.0 }
  0xcd   : > { %v629_v46 = vpop.f32.mrf.mxu2  ;;  %v669_v47 = vpop.f32.mrf.mxu3 }
  0xce   : > { %v551_v48 = vpop.f32.mrf.mxu0  ;;  %v591_v49 = vpop.f32.mrf.mxu1  ;;  %v745_v56 = vmul.f32 %v1892_v42, %v629_v46  ;;  %v761_v57 = vmul.f32 %v1892_v42, %v669_v47 }
  0xcf   : > { %v714_v52 = vmul.f32 %v1892_v42, %v551_v48  ;;  %v730_v53 = vmul.f32 %v1892_v42, %v591_v49 }
  0xd0   : > { %v813_v2 = vadd.f32 %v1898_v44, %v745_v56  ;;  %v829_v3 = vadd.f32 %v1898_v44, %v761_v57 }
  0xd1   : > { %v782_v54 = vadd.f32 %v1898_v44, %v714_v52  ;;  %v798_v55 = vadd.f32 %v1898_v44, %v730_v53 }
  0xd2   : > { %v877_v10 = vmax.f32 %v813_v2, 0.0  ;;  %v893_v11 = vmax.f32 %v829_v3, 0.0 }
  0xd3   : > { %v846_v60 = vmax.f32 %v782_v54, 0.0  ;;  %v862_v61 = vmax.f32 %v798_v55, 0.0 }
  0xd5   : > { %v1345_v62 = vpack.c.bf16 %v846_v60, %v845_v58  ;;  %v1385_v63 = vpack.c.bf16 %v862_v61, %v861_v59  ;;  %v631_v0 = vpop.f32.mrf.mxu2  ;;  %v671_v1 = vpop.f32.mrf.mxu3 }
  0xd6   : > { %v746_v4 = vmul.f32 %v1892_v42, %v631_v0  ;;  %v762_v5 = vmul.f32 %v1892_v42, %v671_v1  ;;  %v554_v6 = vpop.f32.mrf.mxu0  ;;  %v594_v7 = vpop.f32.mrf.mxu1 }
  0xd7   : > { %1346 = vst [vmem:[%s1915_s14] sm:$0xff] %v1345_v62   ;;  %v715_v14 = vmul.f32 %v1892_v42, %v554_v6  ;;  %v731_v15 = vmul.f32 %v1892_v42, %v594_v7 }
  0xd8   : > { %1509 = vst [vmem:[%s1915_s14 + $0x40] sm:$0xff] %v1385_v63   ;;  %v814_v8 = vadd.f32 %v1898_v44, %v746_v4  ;;  %v830_v9 = vadd.f32 %v1898_v44, %v762_v5 }
  0xd9   : > { %v783_v22 = vadd.f32 %v1898_v44, %v715_v14  ;;  %v799_v23 = vadd.f32 %v1898_v44, %v731_v15 }
  0xda   : > { %v878_v12 = vmax.f32 %v814_v8, 0.0  ;;  %v894_v13 = vmax.f32 %v830_v9, 0.0 }
  0xdb   : > { %v847_v30 = vmax.f32 %v783_v22, 0.0  ;;  %v863_v31 = vmax.f32 %v799_v23, 0.0 }
  0xdc   : > { %v1425_v16 = vpack.c.bf16 %v878_v12, %v877_v10  ;;  %v1465_v17 = vpack.c.bf16 %v894_v13, %v893_v11 }
  0xdd   : > { %v634_v18 = vpop.f32.mrf.mxu2  ;;  %v674_v19 = vpop.f32.mrf.mxu3 }
  0xde   : > { %1517 = vst [vmem:[%s1915_s14 + $0x80] sm:$0xff] %v1425_v16   ;;  %v556_v20 = vpop.f32.mrf.mxu0  ;;  %v596_v21 = vpop.f32.mrf.mxu1  ;;  %v747_v28 = vmul.f32 %v1892_v42, %v634_v18  ;;  %v763_v29 = vmul.f32 %v1892_v42, %v674_v19 }
  0xdf   : > { %1525 = vst [vmem:[%s1915_s14 + $0xc0] sm:$0xff] %v1465_v17   ;;  %v716_v24 = vmul.f32 %v1892_v42, %v556_v20  ;;  %v732_v25 = vmul.f32 %v1892_v42, %v596_v21 }
  0xe0   : > { %v815_v38 = vadd.f32 %v1898_v44, %v747_v28  ;;  %v831_v39 = vadd.f32 %v1898_v44, %v763_v29 }
  0xe1   : > { %v784_v26 = vadd.f32 %v1898_v44, %v716_v24  ;;  %v800_v27 = vadd.f32 %v1898_v44, %v732_v25 }
  0xe2   : > { %v879_v48 = vmax.f32 %v815_v38, 0.0  ;;  %v895_v49 = vmax.f32 %v831_v39, 0.0 }
  0xe3   : > { %v848_v32 = vmax.f32 %v784_v26, 0.0  ;;  %v864_v33 = vmax.f32 %v800_v27, 0.0 }
  0xe5   : > { %v1350_v34 = vpack.c.bf16 %v848_v32, %v847_v30  ;;  %v1390_v35 = vpack.c.bf16 %v864_v33, %v863_v31  ;;  %v636_v36 = vpop.f32.mrf.mxu2  ;;  %v676_v37 = vpop.f32.mrf.mxu3 }
  0xe6   : > { %v748_v40 = vmul.f32 %v1892_v42, %v636_v36  ;;  %v764_v41 = vmul.f32 %v1892_v42, %v676_v37  ;;  %v559_v43 = vpop.f32.mrf.mxu0  ;;  %v599_v45 = vpop.f32.mrf.mxu1 }
  0xe7   : > { %1502 = vst [vmem:[%s1915_s14 + $0x8] sm:$0xff] %v1350_v34   ;;  %v717_v52 = vmul.f32 %v1892_v42, %v559_v43  ;;  %v733_v53 = vmul.f32 %v1892_v42, %v599_v45 }
  0xe8   : > { %1510 = vst [vmem:[%s1915_s14 + $0x48] sm:$0xff] %v1390_v35   ;;  %v816_v46 = vadd.f32 %v1898_v44, %v748_v40  ;;  %v832_v47 = vadd.f32 %v1898_v44, %v764_v41 }
  0xe9   : > { %v785_v60 = vadd.f32 %v1898_v44, %v717_v52  ;;  %v801_v61 = vadd.f32 %v1898_v44, %v733_v53 }
  0xea   : > { %v880_v50 = vmax.f32 %v816_v46, 0.0  ;;  %v896_v51 = vmax.f32 %v832_v47, 0.0 }
  0xeb   : > { %v849_v4 = vmax.f32 %v785_v60, 0.0  ;;  %v865_v5 = vmax.f32 %v801_v61, 0.0 }
  0xec   : > { %v1430_v54 = vpack.c.bf16 %v880_v50, %v879_v48  ;;  %v1470_v55 = vpack.c.bf16 %v896_v51, %v895_v49 }
  0xed   : > { %v639_v56 = vpop.f32.mrf.mxu2  ;;  %v679_v57 = vpop.f32.mrf.mxu3 }
  0xee   : > { %1518 = vst [vmem:[%s1915_s14 + $0x88] sm:$0xff] %v1430_v54   ;;  %v561_v58 = vpop.f32.mrf.mxu0  ;;  %v601_v59 = vpop.f32.mrf.mxu1  ;;  %v749_v2 = vmul.f32 %v1892_v42, %v639_v56  ;;  %v765_v3 = vmul.f32 %v1892_v42, %v679_v57 }
  0xef   : > { %1526 = vst [vmem:[%s1915_s14 + $0xc8] sm:$0xff] %v1470_v55   ;;  %v718_v62 = vmul.f32 %v1892_v42, %v561_v58  ;;  %v734_v63 = vmul.f32 %v1892_v42, %v601_v59 }
  0xf0   : > { %v817_v12 = vadd.f32 %v1898_v44, %v749_v2  ;;  %v833_v13 = vadd.f32 %v1898_v44, %v765_v3 }
  0xf1   : > { %v786_v0 = vadd.f32 %v1898_v44, %v718_v62  ;;  %v802_v1 = vadd.f32 %v1898_v44, %v734_v63 }
  0xf2   : > { %v881_v20 = vmax.f32 %v817_v12, 0.0  ;;  %v897_v21 = vmax.f32 %v833_v13, 0.0 }
  0xf3   : > { %v850_v6 = vmax.f32 %v786_v0, 0.0  ;;  %v866_v7 = vmax.f32 %v802_v1, 0.0 }
  0xf5   : > { %v1355_v8 = vpack.c.bf16 %v850_v6, %v849_v4  ;;  %v1395_v9 = vpack.c.bf16 %v866_v7, %v865_v5  ;;  %v641_v10 = vpop.f32.mrf.mxu2  ;;  %v681_v11 = vpop.f32.mrf.mxu3 }
  0xf6   : > { %v750_v14 = vmul.f32 %v1892_v42, %v641_v10  ;;  %v766_v15 = vmul.f32 %v1892_v42, %v681_v11  ;;  %v564_v16 = vpop.f32.mrf.mxu0  ;;  %v604_v17 = vpop.f32.mrf.mxu1 }
  0xf7   : > { %1503 = vst [vmem:[%s1915_s14 + $0x10] sm:$0xff] %v1355_v8   ;;  %v719_v24 = vmul.f32 %v1892_v42, %v564_v16  ;;  %v735_v25 = vmul.f32 %v1892_v42, %v604_v17 }
  0xf8   : > { %1511 = vst [vmem:[%s1915_s14 + $0x50] sm:$0xff] %v1395_v9   ;;  %v818_v18 = vadd.f32 %v1898_v44, %v750_v14  ;;  %v834_v19 = vadd.f32 %v1898_v44, %v766_v15 }
  0xf9   : > { %v787_v32 = vadd.f32 %v1898_v44, %v719_v24  ;;  %v803_v33 = vadd.f32 %v1898_v44, %v735_v25 }
  0xfa   : > { %v882_v22 = vmax.f32 %v818_v18, 0.0  ;;  %v898_v23 = vmax.f32 %v834_v19, 0.0 }
  0xfb   : > { %v851_v40 = vmax.f32 %v787_v32, 0.0  ;;  %v867_v41 = vmax.f32 %v803_v33, 0.0 }
  0xfc   : > { %v1435_v26 = vpack.c.bf16 %v882_v22, %v881_v20  ;;  %v1475_v27 = vpack.c.bf16 %v898_v23, %v897_v21 }
  0xfd   : > { %v644_v28 = vpop.f32.mrf.mxu2  ;;  %v684_v29 = vpop.f32.mrf.mxu3 }
  0xfe   : > { %1519 = vst [vmem:[%s1915_s14 + $0x90] sm:$0xff] %v1435_v26   ;;  %v566_v30 = vpop.f32.mrf.mxu0  ;;  %v606_v31 = vpop.f32.mrf.mxu1  ;;  %v751_v38 = vmul.f32 %v1892_v42, %v644_v28  ;;  %v767_v39 = vmul.f32 %v1892_v42, %v684_v29 }
  0xff   : > { %1527 = vst [vmem:[%s1915_s14 + $0xd0] sm:$0xff] %v1475_v27   ;;  %v720_v34 = vmul.f32 %v1892_v42, %v566_v30  ;;  %v736_v35 = vmul.f32 %v1892_v42, %v606_v31 }
 0x100   : > { %v819_v50 = vadd.f32 %v1898_v44, %v751_v38  ;;  %v835_v51 = vadd.f32 %v1898_v44, %v767_v39 }
 0x101   : > { %v788_v36 = vadd.f32 %v1898_v44, %v720_v34  ;;  %v804_v37 = vadd.f32 %v1898_v44, %v736_v35 }
 0x102   : > { %v883_v58 = vmax.f32 %v819_v50, 0.0  ;;  %v899_v59 = vmax.f32 %v835_v51, 0.0 }
 0x103   : > { %v852_v43 = vmax.f32 %v788_v36, 0.0  ;;  %v868_v45 = vmax.f32 %v804_v37, 0.0 }
 0x105   : > { %v1360_v46 = vpack.c.bf16 %v852_v43, %v851_v40  ;;  %v1400_v47 = vpack.c.bf16 %v868_v45, %v867_v41  ;;  %v646_v48 = vpop.f32.mrf.mxu2  ;;  %v686_v49 = vpop.f32.mrf.mxu3 }
 0x106   : > { %v752_v52 = vmul.f32 %v1892_v42, %v646_v48  ;;  %v768_v53 = vmul.f32 %v1892_v42, %v686_v49  ;;  %v569_v54 = vpop.f32.mrf.mxu0  ;;  %v609_v55 = vpop.f32.mrf.mxu1 }
 0x107   : > { %1504 = vst [vmem:[%s1915_s14 + $0x18] sm:$0xff] %v1360_v46   ;;  %v721_v62 = vmul.f32 %v1892_v42, %v569_v54  ;;  %v737_v63 = vmul.f32 %v1892_v42, %v609_v55 }
 0x108   : > { %1512 = vst [vmem:[%s1915_s14 + $0x58] sm:$0xff] %v1400_v47   ;;  %v820_v56 = vadd.f32 %v1898_v44, %v752_v52  ;;  %v836_v57 = vadd.f32 %v1898_v44, %v768_v53 }
 0x109   : > { %v789_v6 = vadd.f32 %v1898_v44, %v721_v62  ;;  %v805_v7 = vadd.f32 %v1898_v44, %v737_v63 }
 0x10a   : > { %v884_v60 = vmax.f32 %v820_v56, 0.0  ;;  %v900_v61 = vmax.f32 %v836_v57, 0.0 }
 0x10b   : > { %v853_v14 = vmax.f32 %v789_v6, 0.0  ;;  %v869_v15 = vmax.f32 %v805_v7, 0.0 }
 0x10c   : > { %v1440_v0 = vpack.c.bf16 %v884_v60, %v883_v58  ;;  %v1480_v1 = vpack.c.bf16 %v900_v61, %v899_v59 }
 0x10d   : > { %v649_v2 = vpop.f32.mrf.mxu2  ;;  %v689_v3 = vpop.f32.mrf.mxu3 }
 0x10e   : > { %1520 = vst [vmem:[%s1915_s14 + $0x98] sm:$0xff] %v1440_v0   ;;  %v571_v4 = vpop.f32.mrf.mxu0  ;;  %v611_v5 = vpop.f32.mrf.mxu1  ;;  %v753_v12 = vmul.f32 %v1892_v42, %v649_v2  ;;  %v769_v13 = vmul.f32 %v1892_v42, %v689_v3 }
 0x10f   : > { %1528 = vst [vmem:[%s1915_s14 + $0xd8] sm:$0xff] %v1480_v1   ;;  %v722_v8 = vmul.f32 %v1892_v42, %v571_v4  ;;  %v738_v9 = vmul.f32 %v1892_v42, %v611_v5 }
 0x110   : > { %v821_v22 = vadd.f32 %v1898_v44, %v753_v12  ;;  %v837_v23 = vadd.f32 %v1898_v44, %v769_v13 }
 0x111   : > { %v790_v10 = vadd.f32 %v1898_v44, %v722_v8  ;;  %v806_v11 = vadd.f32 %v1898_v44, %v738_v9 }
 0x112   : > { %v885_v30 = vmax.f32 %v821_v22, 0.0  ;;  %v901_v31 = vmax.f32 %v837_v23, 0.0 }
 0x113   : > { %v854_v16 = vmax.f32 %v790_v10, 0.0  ;;  %v870_v17 = vmax.f32 %v806_v11, 0.0 }
 0x115   : > { %v1365_v18 = vpack.c.bf16 %v854_v16, %v853_v14  ;;  %v1405_v19 = vpack.c.bf16 %v870_v17, %v869_v15  ;;  %v651_v20 = vpop.f32.mrf.mxu2  ;;  %v691_v21 = vpop.f32.mrf.mxu3 }
 0x116   : > { %v754_v24 = vmul.f32 %v1892_v42, %v651_v20  ;;  %v770_v25 = vmul.f32 %v1892_v42, %v691_v21  ;;  %v574_v26 = vpop.f32.mrf.mxu0  ;;  %v614_v27 = vpop.f32.mrf.mxu1 }
 0x117   : > { %1505 = vst [vmem:[%s1915_s14 + $0x20] sm:$0xff] %v1365_v18   ;;  %v723_v34 = vmul.f32 %v1892_v42, %v574_v26  ;;  %v739_v35 = vmul.f32 %v1892_v42, %v614_v27 }
 0x118   : > { %1513 = vst [vmem:[%s1915_s14 + $0x60] sm:$0xff] %v1405_v19   ;;  %v822_v28 = vadd.f32 %v1898_v44, %v754_v24  ;;  %v838_v29 = vadd.f32 %v1898_v44, %v770_v25 }
 0x119   : > { %v791_v43 = vadd.f32 %v1898_v44, %v723_v34  ;;  %v807_v45 = vadd.f32 %v1898_v44, %v739_v35 }
 0x11a   : > { %v886_v32 = vmax.f32 %v822_v28, 0.0  ;;  %v902_v33 = vmax.f32 %v838_v29, 0.0 }
 0x11b   : > { %v855_v52 = vmax.f32 %v791_v43, 0.0  ;;  %v871_v53 = vmax.f32 %v807_v45, 0.0 }
 0x11c   : > { %v1445_v36 = vpack.c.bf16 %v886_v32, %v885_v30  ;;  %v1485_v37 = vpack.c.bf16 %v902_v33, %v901_v31 }
 0x11d   : > { %v654_v38 = vpop.f32.mrf.mxu2  ;;  %v694_v39 = vpop.f32.mrf.mxu3 }
 0x11e   : > { %1521 = vst [vmem:[%s1915_s14 + $0xa0] sm:$0xff] %v1445_v36   ;;  %v576_v40 = vpop.f32.mrf.mxu0  ;;  %v616_v41 = vpop.f32.mrf.mxu1  ;;  %v755_v50 = vmul.f32 %v1892_v42, %v654_v38  ;;  %v771_v51 = vmul.f32 %v1892_v42, %v694_v39 }
 0x11f   : > { %1529 = vst [vmem:[%s1915_s14 + $0xe0] sm:$0xff] %v1485_v37   ;;  %v724_v46 = vmul.f32 %v1892_v42, %v576_v40  ;;  %v740_v47 = vmul.f32 %v1892_v42, %v616_v41 }
 0x120   : > { %v823_v60 = vadd.f32 %v1898_v44, %v755_v50  ;;  %v839_v61 = vadd.f32 %v1898_v44, %v771_v51 }
 0x121   : > { %v792_v48 = vadd.f32 %v1898_v44, %v724_v46  ;;  %v808_v49 = vadd.f32 %v1898_v44, %v740_v47 }
 0x122   : > { %v887_v4 = vmax.f32 %v823_v60, 0.0  ;;  %v903_v5 = vmax.f32 %v839_v61, 0.0 }
 0x123   : > { %v856_v54 = vmax.f32 %v792_v48, 0.0  ;;  %v872_v55 = vmax.f32 %v808_v49, 0.0 }
 0x125   : > { %v1370_v56 = vpack.c.bf16 %v856_v54, %v855_v52  ;;  %v1410_v57 = vpack.c.bf16 %v872_v55, %v871_v53  ;;  %v656_v58 = vpop.f32.mrf.mxu2  ;;  %v696_v59 = vpop.f32.mrf.mxu3 }
 0x126   : > { %v756_v62 = vmul.f32 %v1892_v42, %v656_v58  ;;  %v772_v63 = vmul.f32 %v1892_v42, %v696_v59  ;;  %v579_v0 = vpop.f32.mrf.mxu0  ;;  %v619_v1 = vpop.f32.mrf.mxu1 }
 0x127   : > { %1506 = vst [vmem:[%s1915_s14 + $0x28] sm:$0xff] %v1370_v56   ;;  %v725_v8 = vmul.f32 %v1892_v42, %v579_v0  ;;  %v741_v9 = vmul.f32 %v1892_v42, %v619_v1 }
 0x128   : > { %1514 = vst [vmem:[%s1915_s14 + $0x68] sm:$0xff] %v1410_v57   ;;  %v824_v2 = vadd.f32 %v1898_v44, %v756_v62  ;;  %v840_v3 = vadd.f32 %v1898_v44, %v772_v63 }
 0x129   : > { %v793_v16 = vadd.f32 %v1898_v44, %v725_v8  ;;  %v809_v17 = vadd.f32 %v1898_v44, %v741_v9 }
 0x12a   : > { %v888_v6 = vmax.f32 %v824_v2, 0.0  ;;  %v904_v7 = vmax.f32 %v840_v3, 0.0 }
 0x12b   : > { %v857_v24 = vmax.f32 %v793_v16, 0.0  ;;  %v873_v25 = vmax.f32 %v809_v17, 0.0 }
 0x12c   : > { %v1450_v10 = vpack.c.bf16 %v888_v6, %v887_v4  ;;  %v1490_v11 = vpack.c.bf16 %v904_v7, %v903_v5 }
 0x12d   : > { %v659_v12 = vpop.f32.mrf.mxu2  ;;  %v699_v13 = vpop.f32.mrf.mxu3 }
 0x12e   : > { %1522 = vst [vmem:[%s1915_s14 + $0xa8] sm:$0xff] %v1450_v10   ;;  %v581_v14 = vpop.f32.mrf.mxu0  ;;  %v621_v15 = vpop.f32.mrf.mxu1  ;;  %v757_v22 = vmul.f32 %v1892_v42, %v659_v12  ;;  %v773_v23 = vmul.f32 %v1892_v42, %v699_v13 }
 0x12f   : > { %1530 = vst [vmem:[%s1915_s14 + $0xe8] sm:$0xff] %v1490_v11   ;;  %v726_v18 = vmul.f32 %v1892_v42, %v581_v14  ;;  %v742_v19 = vmul.f32 %v1892_v42, %v621_v15 }
 0x130   : > { %v825_v32 = vadd.f32 %v1898_v44, %v757_v22  ;;  %v841_v33 = vadd.f32 %v1898_v44, %v773_v23 }
 0x131   : > { %v794_v20 = vadd.f32 %v1898_v44, %v726_v18  ;;  %v810_v21 = vadd.f32 %v1898_v44, %v742_v19 }
 0x132   : > { %v889_v40 = vmax.f32 %v825_v32, 0.0  ;;  %v905_v41 = vmax.f32 %v841_v33, 0.0 }
 0x133   : > { %v858_v26 = vmax.f32 %v794_v20, 0.0  ;;  %v874_v27 = vmax.f32 %v810_v21, 0.0 }
 0x135   : > { %v1375_v28 = vpack.c.bf16 %v858_v26, %v857_v24  ;;  %v1415_v29 = vpack.c.bf16 %v874_v27, %v873_v25  ;;  %v661_v30 = vpop.f32.mrf.mxu2  ;;  %v701_v31 = vpop.f32.mrf.mxu3 }
 0x136   : > { %v758_v34 = vmul.f32 %v1892_v42, %v661_v30  ;;  %v774_v35 = vmul.f32 %v1892_v42, %v701_v31  ;;  %v584_v36 = vpop.f32.mrf.mxu0  ;;  %v624_v37 = vpop.f32.mrf.mxu1 }
 0x137   : > { %1507 = vst [vmem:[%s1915_s14 + $0x30] sm:$0xff] %v1375_v28   ;;  %v727_v46 = vmul.f32 %v1892_v42, %v584_v36  ;;  %v743_v47 = vmul.f32 %v1892_v42, %v624_v37 }
 0x138   : > { %1515 = vst [vmem:[%s1915_s14 + $0x70] sm:$0xff] %v1415_v29   ;;  %v826_v38 = vadd.f32 %v1898_v44, %v758_v34  ;;  %v842_v39 = vadd.f32 %v1898_v44, %v774_v35 }
 0x139   : > { %v795_v54 = vadd.f32 %v1898_v44, %v727_v46  ;;  %v811_v55 = vadd.f32 %v1898_v44, %v743_v47 }
 0x13a   : > { %v890_v43 = vmax.f32 %v826_v38, 0.0  ;;  %v906_v45 = vmax.f32 %v842_v39, 0.0 }
 0x13b   : > { %v859_v62 = vmax.f32 %v795_v54, 0.0  ;;  %v875_v63 = vmax.f32 %v811_v55, 0.0 }
 0x13c   : > { %v1455_v48 = vpack.c.bf16 %v890_v43, %v889_v40  ;;  %v1495_v49 = vpack.c.bf16 %v906_v45, %v905_v41 }
 0x13d   : > { %v664_v50 = vpop.f32.mrf.mxu2  ;;  %v704_v51 = vpop.f32.mrf.mxu3 }
 0x13e   : > { %1523 = vst [vmem:[%s1915_s14 + $0xb0] sm:$0xff] %v1455_v48   ;;  %v586_v52 = vpop.f32.mrf.mxu0  ;;  %v626_v53 = vpop.f32.mrf.mxu1  ;;  %v759_v60 = vmul.f32 %v1892_v42, %v664_v50  ;;  %v775_v61 = vmul.f32 %v1892_v42, %v704_v51 }
 0x13f   : > { %1531 = vst [vmem:[%s1915_s14 + $0xf0] sm:$0xff] %v1495_v49   ;;  %v728_v56 = vmul.f32 %v1892_v42, %v586_v52  ;;  %v744_v57 = vmul.f32 %v1892_v42, %v626_v53 }
 0x140   : > { %v827_v6 = vadd.f32 %v1898_v44, %v759_v60  ;;  %v843_v7 = vadd.f32 %v1898_v44, %v775_v61 }
 0x141   : > { %v796_v58 = vadd.f32 %v1898_v44, %v728_v56  ;;  %v812_v59 = vadd.f32 %v1898_v44, %v744_v57 }
 0x142   : > { %v891_v12 = vmax.f32 %v827_v6, 0.0  ;;  %v907_v13 = vmax.f32 %v843_v7, 0.0 }
 0x143   : > { %v860_v0 = vmax.f32 %v796_v58, 0.0  ;;  %v876_v1 = vmax.f32 %v812_v59, 0.0 }
 0x145   : > { %v1380_v2 = vpack.c.bf16 %v860_v0, %v859_v62  ;;  %v1420_v3 = vpack.c.bf16 %v876_v1, %v875_v63  ;;  %v666_v4 = vpop.f32.mrf.mxu2  ;;  %v706_v5 = vpop.f32.mrf.mxu3 }
 0x146   : > { %v760_v8 = vmul.f32 %v1892_v42, %v666_v4  ;;  %v776_v9 = vmul.f32 %v1892_v42, %v706_v5 }
 0x147   : > { %1508 = vst [vmem:[%s1915_s14 + $0x38] sm:$0xff] %v1380_v2  }
 0x148   : > { %1516 = vst [vmem:[%s1915_s14 + $0x78] sm:$0xff] %v1420_v3   ;;  %v828_v10 = vadd.f32 %v1898_v44, %v760_v8  ;;  %v844_v11 = vadd.f32 %v1898_v44, %v776_v9 }
 0x14a   : > { %v892_v14 = vmax.f32 %v828_v10, 0.0  ;;  %v908_v42 = vmax.f32 %v844_v11, 0.0 }
 0x14c   : > { %v1460_v15 = vpack.c.bf16 %v892_v14, %v891_v12  ;;  %v1500_v16 = vpack.c.bf16 %v908_v42, %v907_v13 }
 0x14e   : > { %1524 = vst [vmem:[%s1915_s14 + $0xb8] sm:$0xff] %v1460_v15  }
 0x14f   : > { %1532 = vst [vmem:[%s1915_s14 + $0xf8] sm:$0xff] %v1500_v16  }
 0x150   : > { %1666 = shalt.err (!%p1663_p4)
}
 0x151   : > { %s1709_s7 = smov 64   ;;  %s1710_s20 = smov 4  }
 0x152   : > { %1559 = dma.vmem_to_hbm [thread:$0]  (%p1785_p10), %s1051_s19, 4096, %s1053_s30, %s1038_s5, %s1709_s7, %s1709_s7, %s1710_s20  }
 0x153 PF: > { %p1570_p5 = scmp.ge.s32.totalorder %s1705_s18, 2  ;;  %s1067_s22 = sand.u32 1, %s1693_s15  }
 0x154   : > { %s1068_s14 = scalar_lea.sflag [#allocation4], %s1067_s22 }
 0x155   : > { %p1566_p7 = pnand %p1570_p5, %p1789_p11 }
 0x157   : > { %p1567_p8 = pneg %p1566_p7 }
 0x159   : > { %1688 = dma.done.wait (%p1567_p8), %s1068_s14, 4096  }
 0x15a   : > { %1690 = vsyncadd (%p1567_p8), %s1068_s14, 4294963200  ;;  %p17_p9 = scmp.ge.s32.totalorder %s1761_s21, 34   ;;  %s2106_s15 = smov %s1697_s16 }
 0x15b   : > { %s2107_s16 = smov %s1701_s17  ;;  %s2108_s17 = smov %s1773_s24 }
 0x15c   : > { %s2109_s18 = smov %s1761_s21  ;;  %19 = sbr.rel (!%p17_p9) target bundleno = 5 (0x5), region = 81 }
 0x161   :  { %1074 = vsyncpa [#allocation3], 1 }
 0x162   :  { %1076 = vsyncpa [#allocation3 + $0x1], 1 }
 0x163   :  { %1077 = vsyncpa [#allocation4], 1 }
 0x164   :  { %1079 = vsyncpa [#allocation4 + $0x1], 1 }

</bundles_post_ra>
